<compile_context>
chip_gen: v7x
topology: tpu7x:2x2x1
jax: 0.10.0
libtpu: 0.0.40
codegen_flags: <defaults>
</compile_context>

<pallas_src>
import functools

import jax
import jax.numpy as jnp
from jax.experimental import pallas as pl
from jax.experimental.pallas import tpu as pltpu


def adain_kernel(content_ref, smean_ref, sstd_ref, out_ref, *, hw_valid, padded):
    # content_ref: (1, TC, HWp)   smean_ref / sstd_ref: (1, TC, 1)
    x = content_ref[...].astype(jnp.float32)

    if padded:
        # Mask out padded lanes from the statistics.
        lane = jax.lax.broadcasted_iota(jnp.int32, x.shape, dimension=2)
        mask = (lane < hw_valid).astype(jnp.float32)
        xm = x * mask
        mean = jnp.sum(xm, axis=-1, keepdims=True) / jnp.float32(hw_valid)
        diff = (x - mean) * mask
    else:
        mean = jnp.mean(x, axis=-1, keepdims=True)
        diff = x - mean

    # torch.std default is unbiased (Bessel's correction, divide by HW-1).
    denom = jnp.float32(max(hw_valid - 1, 1))
    var = jnp.sum(diff * diff, axis=-1, keepdims=True) / denom
    std = jnp.sqrt(var)

    smean = smean_ref[...].astype(jnp.float32)  # (1, TC, 1)
    sstd = sstd_ref[...].astype(jnp.float32)    # (1, TC, 1)

    # Fused affine: only TC divides per block (cheap), then one FMA/element.
    scale = sstd / (std + jnp.float32(1e-5))    # (1, TC, 1)
    shift = smean - mean * scale                # (1, TC, 1)

    out_ref[...] = (x * scale + shift).astype(out_ref.dtype)


def _choose_channel_tile(c, hw_padded, itemsize, target_bytes=2 * 1024 * 1024):
    """Largest TC that is a multiple of 8, divides C, and keeps a block <= target."""
    if c % 8 != 0:
        # Can't form a packed sublane tile that divides C; use the full dim
        # (a block equal to the full array dim is always legal).
        return c
    best = 8
    tc = 8
    while tc <= c:
        if c % tc == 0 and tc * hw_padded * itemsize <= target_bytes:
            best = tc
        tc += 8
    return best


def adain(content, style_mean, style_std):
    """content: (N, C, H, W); style_mean/style_std: (N, C, 1, 1). Returns NCHW."""
    n, c, h, w = content.shape
    hw = h * w
    hw_padded = ((hw + 127) // 128) * 128
    padded = hw_padded != hw

    content_flat = content.reshape(n, c, hw)
    if padded:
        content_flat = jnp.pad(
            content_flat, ((0, 0), (0, 0), (0, hw_padded - hw))
        )
    smean = style_mean.reshape(n, c, 1)
    sstd = style_std.reshape(n, c, 1)

    itemsize = jnp.dtype(content.dtype).itemsize
    tc = _choose_channel_tile(c, hw_padded, itemsize)
    grid = (n, c // tc)

    kernel = functools.partial(adain_kernel, hw_valid=hw, padded=padded)

    out_flat = pl.pallas_call(
        kernel,
        out_shape=jax.ShapeDtypeStruct((n, c, hw_padded), content.dtype),
        grid_spec=pltpu.PrefetchScalarGridSpec(
            num_scalar_prefetch=0,
            grid=grid,
            in_specs=[
                pl.BlockSpec((1, tc, hw_padded), lambda i, j: (i, j, 0)),
                pl.BlockSpec((1, tc, 1), lambda i, j: (i, j, 0)),
                pl.BlockSpec((1, tc, 1), lambda i, j: (i, j, 0)),
            ],
            out_specs=pl.BlockSpec((1, tc, hw_padded), lambda i, j: (i, j, 0)),
        ),
        compiler_params=pltpu.CompilerParams(
            dimension_semantics=("parallel", "parallel"),
        ),
        cost_estimate=pl.CostEstimate(
            flops=5 * n * c * hw,
            transcendentals=n * c,
            bytes_accessed=2 * n * c * hw * itemsize + 2 * n * c * itemsize,
        ),
    )(content_flat, smean, sstd)

    if padded:
        out_flat = out_flat[:, :, :hw]
    return out_flat.reshape(n, c, h, w)


def adain_ref(content, style_mean, style_std):
    # Pure-JAX reference mirroring torch semantics (unbiased std).
    mean = jnp.mean(content, axis=(2, 3), keepdims=True)
    std = jnp.std(content, axis=(2, 3), keepdims=True, ddof=1)
    normalized = (content - mean) / (std + 1e-5)
    return style_std * normalized + style_mean


if __name__ == "__main__":
    key = jax.random.PRNGKey(0)
    k1, k2, k3 = jax.random.split(key, 3)

    N, C, H, W = 2, 4, 16, 16
    content = jax.random.normal(k1, (N, C, H, W), dtype=jnp.float32)
    style_mean = jax.random.normal(k2, (N, C, 1, 1), dtype=jnp.float32)
    style_std = jax.random.uniform(k3, (N, C, 1, 1), dtype=jnp.float32) + 0.5

    out = adain(content, style_mean, style_std)
    out = jax.block_until_ready(out)

    ref = adain_ref(content, style_mean, style_std)
    assert out.shape == (N, C, H, W)
    assert jnp.allclose(out, ref, atol=1e-4, rtol=1e-4), "mismatch vs reference"

    print("KERNEL_OK")
</pallas_src>

<mosaic_0001>
module attributes {stable_mosaic.version = 11 : i64} {
  func.func @adain_kernel(%arg0: i32, %arg1: i32, %arg2: memref<1x4x256xf32, #tpu.memory_space<vmem>>, %arg3: memref<1x4x1xf32, #tpu.memory_space<vmem>>, %arg4: memref<1x4x1xf32, #tpu.memory_space<vmem>>, %arg5: memref<1x4x256xf32, #tpu.memory_space<vmem>>) attributes {dimension_semantics = [#tpu.dimension_semantics<parallel>, #tpu.dimension_semantics<parallel>], iteration_bounds = array<i64: 2, 1>, scalar_prefetch = 0 : i64, scratch_operands = 0 : i64, tpu.core_type = #tpu.core_type<tc>, window_params = [{transform_indices = @transform_0, window_bounds = array<i64: 1, 4, 256>}, {transform_indices = @transform_1, window_bounds = array<i64: 1, 4, 1>}, {transform_indices = @transform_2, window_bounds = array<i64: 1, 4, 1>}, {transform_indices = @transform_3, window_bounds = array<i64: 1, 4, 256>}]} {
    %c0 = arith.constant 0 : index
    %c0_0 = arith.constant 0 : index
    %c0_1 = arith.constant 0 : index
    %0 = vector.load %arg2[%c0, %c0_0, %c0_1] : memref<1x4x256xf32, #tpu.memory_space<vmem>>, vector<1x4x256xf32>
    %cst = arith.constant dense<0.000000e+00> : vector<1x4xf32>
    %1 = vector.multi_reduction <add>, %0, %cst [2] : vector<1x4x256xf32> to vector<1x4xf32>
    %2 = vector.shape_cast %1 : vector<1x4xf32> to vector<1x4x1xf32>
    %cst_2 = arith.constant 2.560000e+02 : f32
    %3 = vector.broadcast %cst_2 : f32 to vector<1x4x1xf32>
    %4 = arith.divf %2, %3 : vector<1x4x1xf32>
    %5 = vector.broadcast %4 : vector<1x4x1xf32> to vector<1x4x256xf32>
    %6 = arith.subf %0, %5 : vector<1x4x256xf32>
    %7 = arith.mulf %6, %6 : vector<1x4x256xf32>
    %cst_3 = arith.constant dense<0.000000e+00> : vector<1x4xf32>
    %8 = vector.multi_reduction <add>, %7, %cst_3 [2] : vector<1x4x256xf32> to vector<1x4xf32>
    %9 = vector.shape_cast %8 : vector<1x4xf32> to vector<1x4x1xf32>
    %cst_4 = arith.constant 2.550000e+02 : f32
    %10 = vector.broadcast %cst_4 : f32 to vector<1x4x1xf32>
    %11 = arith.divf %9, %10 : vector<1x4x1xf32>
    %12 = math.sqrt %11 : vector<1x4x1xf32>
    %c0_5 = arith.constant 0 : index
    %c0_6 = arith.constant 0 : index
    %c0_7 = arith.constant 0 : index
    %13 = vector.load %arg3[%c0_5, %c0_6, %c0_7] : memref<1x4x1xf32, #tpu.memory_space<vmem>>, vector<1x4x1xf32>
    %c0_8 = arith.constant 0 : index
    %c0_9 = arith.constant 0 : index
    %c0_10 = arith.constant 0 : index
    %14 = vector.load %arg4[%c0_8, %c0_9, %c0_10] : memref<1x4x1xf32, #tpu.memory_space<vmem>>, vector<1x4x1xf32>
    %cst_11 = arith.constant 9.99999974E-6 : f32
    %15 = vector.broadcast %cst_11 : f32 to vector<1x4x1xf32>
    %16 = arith.addf %12, %15 : vector<1x4x1xf32>
    %17 = arith.divf %14, %16 : vector<1x4x1xf32>
    %18 = arith.mulf %4, %17 : vector<1x4x1xf32>
    %19 = arith.subf %13, %18 : vector<1x4x1xf32>
    %20 = vector.broadcast %17 : vector<1x4x1xf32> to vector<1x4x256xf32>
    %21 = arith.mulf %0, %20 : vector<1x4x256xf32>
    %22 = vector.broadcast %19 : vector<1x4x1xf32> to vector<1x4x256xf32>
    %23 = arith.addf %21, %22 : vector<1x4x256xf32>
    %c0_12 = arith.constant 0 : index
    %c0_13 = arith.constant 0 : index
    %c0_14 = arith.constant 0 : index
    %24 = vector.load %arg5[%c0_12, %c0_13, %c0_14] : memref<1x4x256xf32, #tpu.memory_space<vmem>>, vector<1x4x256xf32>
    tpu.vector_store %arg5[%c0_12, %c0_13, %c0_14], %23 {strides = array<i32>} : memref<1x4x256xf32, #tpu.memory_space<vmem>>, vector<1x4x256xf32>,
    return
  }
  func.func @transform_0(%arg0: i32, %arg1: i32) -> (i32, i32, i32) {
    %c0_i32 = arith.constant 0 : i32
    %c0_i32_0 = arith.constant 0 : i32
    return %arg0, %arg1, %c0_i32 : i32, i32, i32
  }
  func.func @transform_1(%arg0: i32, %arg1: i32) -> (i32, i32, i32) {
    %c0_i32 = arith.constant 0 : i32
    %c0_i32_0 = arith.constant 0 : i32
    return %arg0, %arg1, %c0_i32 : i32, i32, i32
  }
  func.func @transform_2(%arg0: i32, %arg1: i32) -> (i32, i32, i32) {
    %c0_i32 = arith.constant 0 : i32
    %c0_i32_0 = arith.constant 0 : i32
    return %arg0, %arg1, %c0_i32 : i32, i32, i32
  }
  func.func @transform_3(%arg0: i32, %arg1: i32) -> (i32, i32, i32) {
    %c0_i32 = arith.constant 0 : i32
    %c0_i32_0 = arith.constant 0 : i32
    return %arg0, %arg1, %c0_i32 : i32, i32, i32
  }
}

</mosaic_0001>

<bundles_post_ra>
// kernel: tpu_custom_call.1
= control target key start
LH: loop header
LB: loop body
LE: loop exit
PB: predicated region body
PF: predicated region fallthrough
CT: control target
= control target key end

     0   :  { %8 = vsyncpa [#allocation3], 0  ;;  %s763_s0 = inlined_call_operand.vmem [shape: f32[2,4,256], index: 0, kind: input, shape index: {}]   ;;  %s764_s1 = inlined_call_operand.vmem [shape: f32[2,4,1], index: 1, kind: input, shape index: {}]   ;;  %s765_s2 = inlined_call_operand.vmem [shape: f32[2,4,1], index: 2, kind: input, shape index: {}]   ;;  %s766_s3 = inlined_call_operand.hbm [shape: f32[2,4,256], index: 3, kind: output, shape index: {}]  }
   0x1   :  { %10 = vsyncpa [#allocation3 + $0x1], 0  ;;  %s637_s12 = smov 0   ;;  %s639_s13 = smov 0  }
   0x2   :  { %s641_s14 = smov 0   ;;  %s643_s15 = smov 0  }
   0x3   :  { %s645_s16 = smov 0   ;;  %s647_s17 = smov 0  }
   0x4 LB: > { %s453_s18 = sadd.s32 4294967295, %s612_s17   ;;  %s454_s19 = sadd.s32 4294967294, %s612_s17   ;;  %s612_s17 = sphi %s647_s17, %s16_s17   ;;  %s608_s16 = sphi %s645_s16, %s773_s16   ;;  %s604_s15 = sphi %s643_s15, %s772_s15   ;;  %s600_s14 = sphi %s641_s14, %s771_s14   ;;  %s596_s13 = sphi %s639_s13, %s770_s13   ;;  %s592_s12 = sphi %s637_s12, %s769_s12  }
   0x5   : > { %s28_s20 = sadd.s32 1, %s608_s16  ;;  %s121_s21 = sadd.s32 1, %s600_s14 }
   0x6   : > { %p30_p0 = scmp.ge.s32.totalorder %s28_s20, 2  ;;  %p131_p1 = scmp.ne.s32.totalorder %s600_s14, %s596_s13 }
   0x7   : > { %p132_p2 = scmp.eq.s32.totalorder %s453_s18, 1  ;;  %p137_p3 = scmp.ne.s32.totalorder %s596_s13, %s592_s12 }
   0x8   : > { %s775_s20 = smov (%p30_p0, %s28_s20), 0  ;;  %p138_p5 = scmp.eq.s32.totalorder %s454_s19, 1 }
   0x9   : > { %p677_p4 = por %p132_p2, %p131_p1  ;;  %s116_s23 = ssub.s32 %s608_s16, %s775_s20 }
   0xa   : > { %p457_p6 = scmp.ge.s32.totalorder %s612_s17, 1  ;;  %p119_p7 = scmp.eq.s32.totalorder %s116_s23, 0 }
   0xb   : > { %p684_p8 = por %p138_p5, %p137_p3  ;;  %p188_p9 = scmp.lt.s32.totalorder %s612_s17, 3 }
   0xc   : > { %s690_s25 = scalar_select %p119_p7, %s600_s14, %s121_s21  }
   0xd   : > { %p189_p10 = pnand %p457_p6, %p188_p9 }
   0xe   : > { %p230_p11 = scmp.lt.s32.totalorder (!%p189_p10), %s604_s15, 1  ;;  %vm257_vm0 = vcmask (!%p189_p10), 1043456   ;;  %v614_v5 = vmov (!%p189_p10), 839922192   ;;  %v269_v7 = vlaneseq (!%p189_p10)  ;;  %v615_v20 = vmov (!%p189_p10), 0   ;;  %s227_s11 = sand.u32 (!%p189_p10), 1, %s596_s13  }
   0xf   : > { %192 = sbr.rel (%p189_p10) target bundleno = 511 (0x1ff), region = 32  ;;  %v267_v6 = vunpack.c.l.s4 (!%p189_p10), %v614_v5  ;;  %527 = vset.pattern.permute.xlu1 (!%p189_p10), %v615_v20  ;;  %528 = vset.pattern.permute.xlu0 (!%p189_p10), %v615_v20  ;;  %s458_s18 = sshll.u32 (!%p189_p10), %s227_s11, 3 }
  0x10   : > { %v270_v9 = vshrl.u32 (!%p189_p10), %v269_v7, 7  ;;  %s469_s19 = sshll.u32 (!%p189_p10), %s604_s15, 7  ;;  %s229_s21 = scalar_lea.vmem (!%p189_p10), [#allocation2], %s458_s18 }
  0x11   : > { %v268_v8 = vunpack.c.0.s8 (!%p189_p10), %v267_v6  ;;  %s344_s23 = sshll.u32 (!%p189_p10), %s229_s21, 4  ;;  %s716_s28 = scalar_lea.hbm (!%p189_p10), %s766_s3, %s469_s19  ;;  %s718_s23 = int_to_ptr.vmem [resolvable:$true] %s344_s23 }
  0x12   : > { %s328_s29 = scalar_lea.sflag (!%p189_p10), [#allocation3], %s227_s11 }
  0x13   : > { %v271_v10 = vsub.s32 (!%p189_p10), %v268_v8, %v270_v9 }
  0x16   : > { %s694_s26 = scalar_select %p230_p11, %s604_s15, 1 }
  0x17   : > { %s616_s15 = smov [#allocation2]  }
  0x18   : > { %s468_s27 = sshll.u32 %s694_s26, 3  ;;  %s461_s4 = sshll.u32 %s694_s26, 2 }
  0x19   : > { %s238_s30 = scalar_lea.vmem %s763_s0, %s468_s27  ;;  %s252_s7 = scalar_lea.vmem %s765_s2, %s461_s4 }
  0x1a   : > { %v253_v0 = vld [vmem:[%s238_s30] sm:$0xff]  ;;  %s245_s10 = scalar_lea.vmem %s764_s1, %s461_s4  ;;  %s534_s30 = scalar_lea.vmem %s718_s23, 128 }
  0x1b   : > { %v255_v1 = vcombine.high %v253_v0, %v253_v0  ;;  %v258_v2 = vsel %vm257_vm0, %v253_v0, 0.0  ;;  %v294_v29 = vld [vmem:[%s252_s7] sm:$0xf]  ;;  %p535_p12 = scmp.ne.s32.totalorder %s718_s23, %s534_s30  ;;  %s538_s4 = sshll.u32 %s616_s15, 4  ;;  %s539_s4 = int_to_ptr.vmem [resolvable:$false] %s538_s4 }
  0x1c   : > { %v293_v32 = vld [vmem:[%s245_s10] sm:$0xf]  ;;  %s540_s5 = scalar_lea.vmem %s539_s4, 256  ;;  %p541_p1 = scmp.lt.s32.totalorder %s718_s23, %s539_s4 }
  0x1d   : > { %v259_v3 = vsel %vm257_vm0, %v255_v1, 0.0  ;;  %p536_p13 = pnand %p535_p12, %p677_p4  ;;  %p542_p2 = scmp.lt.s32.totalorder %s540_s5, %s534_s30 }
  0x1e   : > { %v260_v4 = vadd.f32 %v259_v3, %v258_v2 }
  0x1f   : > { %p537_p0 = pneg %p536_p13  ;;  %p543_p3 = por %p542_p2, %p541_p1 }
  0x20   : > { %261 = vadd.xlane.f32.xlu0 %v260_v4 }
  0x21   : > { %p544_p5 = pnand %p543_p3, %p537_p0 }
  0xad   : > { %v262_v11 = vpop.xlane.xlu0 %261 }
  0xae   : > { %v264_v12 = vmul.f32 0.00390625, %v262_v11 }
  0xb0   : > { %v272_v13 = vrot.slane %v264_v12, %v271_v10 }
  0xb2   : > { %v274_v14 = vsub.f32 %v253_v0, %v272_v13 }
  0xb4   : > { %v275_v15 = vmul.f32 %v274_v14, %v274_v14 }
  0xb6   : > { %v277_v16 = vcombine.high %v275_v15, %v275_v15  ;;  %v279_v17 = vsel %vm257_vm0, %v275_v15, 0.0 }
  0xb8   : > { %v280_v18 = vsel %vm257_vm0, %v277_v16, 0.0 }
  0xb9   : > { %v281_v19 = vadd.f32 %v280_v18, %v279_v17 }
  0xbb   : > { %282 = vadd.xlane.f32.xlu0 %v281_v19 }
 0x148   : > { %v283_v21 = vpop.xlane.xlu0 %282 }
 0x149   : > { %v285_v22 = vmul.f32 0.003921569, %v283_v21 }
 0x14b   : > { %530 = vrsqrt.f32 %v285_v22  ;;  %vm288_vm1 = vcmp.eq.f32.partialorder %v285_v22, inf  ;;  %v291_v25 = vand.u32 2147483648, %v285_v22  ;;  %vm290_vm2 = vcmp.eq.f32.partialorder %v285_v22, 0.0 }
 0x155   : > { %v531_v23 = vpop.eup %530 }
 0x156   : > { %v287_v24 = vmul.f32 %v531_v23, %v285_v22 }
 0x158   : > { %v289_v26 = vsel %vm288_vm1, %v285_v22, %v287_v24 }
 0x159   : > { %v292_v27 = vsel %vm290_vm2, %v291_v25, %v289_v26 }
 0x15a   : > { %v295_v28 = vadd.f32 1e-05, %v292_v27 }
 0x15c   : > { %532 = vrcp.f32 %v295_v28 }
 0x166   : > { %v533_v30 = vpop.eup %532 }
 0x167   : > { %v297_v31 = vmul.f32 %v533_v30, %v294_v29 }
 0x169   : > { %302 = vperm.xlu1 %527, %v297_v31   ;;  %v298_v33 = vmul.f32 %v297_v31, %v264_v12 }
 0x16b   : > { %v299_v34 = vsub.f32 %v293_v32, %v298_v33 }
 0x16d   : > { %315 = vperm.xlu1 %527, %v299_v34  }
 0x1e8   : > { %v303_v35 = vpop.permute.xlu1 %302 }
 0x1e9   : > { %v310_v36 = vrot.slane %v303_v35, %v271_v10 }
 0x1eb   : > { %v312_v38 = vmul.f32 %v310_v36, %v253_v0 }
 0x1ec   : > { %v316_v37 = vpop.permute.xlu1 %315 }
 0x1ed   : > { %v323_v39 = vrot.slane %v316_v37, %v271_v10 }
 0x1ef   : > { %v325_v40 = vadd.f32 %v323_v39, %v312_v38 }
 0x1f1   : > { %326 = vst [vmem:[%s229_s21] sm:$0xff] %v325_v40 }
 0x1f2   : > { %547 = shalt.err (!%p544_p5)
}
 0x1f3   : > { %s548_s6 = scalar_lea.hbm %s716_s28, 128  ;;  %s552_s9 = scalar_lea.hbm %s766_s3, 256 }
 0x1f4   : > { %p549_p6 = scmp.ne.s32.totalorder %s716_s28, %s548_s6  ;;  %p553_p10 = scmp.lt.u32.totalorder %s716_s28, %s766_s3 }
 0x1f5   : > { %p554_p11 = scmp.lt.u32.totalorder %s552_s9, %s548_s6  ;;  %p556_p13 = scmp.lt.u32.totalorder %s548_s6, %s716_s28 }
 0x1f6   : > { %p550_p7 = pnand %p549_p6, %p677_p4 }
 0x1f7   : > { %p555_p12 = por %p554_p11, %p553_p10 }
 0x1f8   : > { %p551_p9 = pneg %p550_p7 }
 0x1f9   : > { %p557_p0 = por %p556_p13, %p555_p12 }
 0x1fb   : > { %p558_p1 = pnand %p557_p0, %p551_p9 }
 0x1fd   : > { %561 = shalt.err (!%p558_p1)
}
 0x1fe   : > { %470 = dma.vmem_to_hbm [thread:$0]  (%p677_p4), %s718_s23, 128, %s716_s28, %s328_s29  }
 0x1ff PF: > { %p476_p2 = scmp.ge.s32.totalorder %s612_s17, 2  ;;  %s356_s18 = sand.u32 1, %s592_s12  }
 0x200   : > { %s357_s19 = scalar_lea.sflag [#allocation3], %s356_s18 }
 0x201   : > { %p473_p3 = pnand %p476_p2, %p684_p8 }
 0x203   : > { %587 = dma.done.wait (!%p473_p3), %s357_s19, 128  }
 0x204   : > { %589 = vsyncadd (!%p473_p3), %s357_s19, 4294967168  ;;  %s16_s17 = sadd.s32 1, %s612_s17   ;;  %s769_s12 = smov %s596_s13 }
 0x205   : > { %p13_p5 = scmp.ge.s32.totalorder %s16_s17, 4   ;;  %s770_s13 = smov %s600_s14 }
 0x206   : > { %s771_s14 = smov %s690_s25  ;;  %s772_s15 = smov %s608_s16 }
 0x207   : > { %s773_s16 = smov %s775_s20  ;;  %15 = sbr.rel (!%p13_p5) target bundleno = 4 (0x4), region = 73 }
 0x20e   :  { %362 = vsyncpa [#allocation3], 1 }
 0x20f   :  { %364 = vsyncpa [#allocation3 + $0x1], 1 }

</bundles_post_ra>
